<compile_context>
chip_gen: v6e
topology: v6e:2x2x1
jax: 0.10.0
libtpu: 0.0.40
codegen_flags: <defaults>
</compile_context>

<pallas_src>
import functools

import jax
import jax.numpy as jnp
from jax import lax
from jax.experimental import pallas as pl
from jax.experimental.pallas import tpu as pltpu

EPS = 1e-5


def _add_instance_norm_kernel(x1_ref, x2_ref, w_ref, b_ref, o_ref, *, inv_p):
    # x1_ref, x2_ref, o_ref: (TB, P, E);  w_ref, b_ref: (1, E)
    added = (x1_ref[...] + x2_ref[...]).astype(jnp.float32)        # residual add, f32 stats
    # Per-(sample, channel) statistics over the problem axis P (axis=1, sublanes).
    mean = jnp.sum(added, axis=1, keepdims=True) * inv_p            # (TB, 1, E)
    mean_sq = jnp.sum(added * added, axis=1, keepdims=True) * inv_p
    var = jnp.maximum(mean_sq - mean * mean, 0.0)                   # biased variance
    inv = lax.rsqrt(var + EPS)                                      # EUP, (TB, 1, E)
    # Fuse the affine into per-channel scalars; single full-tile FMA on store.
    scale = inv * w_ref[...].astype(jnp.float32)                    # (TB, 1, E)
    shift = b_ref[...].astype(jnp.float32) - mean * scale           # (TB, 1, E)
    o_ref[...] = (added * scale + shift).astype(o_ref.dtype)


def _pick_block_batch(B, P, E, itemsize, target_bytes=2 << 20):
    """Largest divisor of B whose (TB, P, E) block stays ~<= target_bytes,
    while keeping >= 2 grid steps (megacore) whenever B >= 2."""
    max_tb = max(1, target_bytes // max(1, P * E * itemsize))
    tb = 1
    for d in range(1, B + 1):
        if B % d == 0 and d <= max_tb:
            tb = d
    if B >= 2 and B // tb < 2:
        for d in range(tb, 0, -1):
            if B % d == 0 and B // d >= 2:
                tb = d
                break
    return tb


def add_and_normalize(input1, input2, weight, bias, *, block_batch=None):
    """input1, input2: (B, P, E); weight, bias: (E,). Returns (B, P, E)."""
    B, P, E = input1.shape
    assert input2.shape == (B, P, E)
    itemsize = jnp.dtype(input1.dtype).itemsize
    if block_batch is None:
        block_batch = _pick_block_batch(B, P, E, itemsize)
    assert B % block_batch == 0, "block_batch must divide the batch size"

    w2 = weight.reshape(1, E)
    b2 = bias.reshape(1, E)
    kernel = functools.partial(_add_instance_norm_kernel, inv_p=1.0 / P)

    return pl.pallas_call(
        kernel,
        out_shape=jax.ShapeDtypeStruct((B, P, E), input1.dtype),
        grid_spec=pltpu.PrefetchScalarGridSpec(
            num_scalar_prefetch=0,
            grid=(B // block_batch,),
            in_specs=[
                pl.BlockSpec((block_batch, P, E), lambda b: (b, 0, 0)),
                pl.BlockSpec((block_batch, P, E), lambda b: (b, 0, 0)),
                pl.BlockSpec((1, E), lambda b: (0, 0)),   # weight: VMEM-resident
                pl.BlockSpec((1, E), lambda b: (0, 0)),   # bias:   VMEM-resident
            ],
            out_specs=pl.BlockSpec((block_batch, P, E), lambda b: (b, 0, 0)),
        ),
        compiler_params=pltpu.CompilerParams(
            dimension_semantics=("parallel",)),
    )(input1, input2, w2, b2)


def _reference(input1, input2, weight, bias):
    added = (input1 + input2).astype(jnp.float32)
    mean = jnp.mean(added, axis=1, keepdims=True)
    var = jnp.mean((added - mean) ** 2, axis=1, keepdims=True)
    normed = (added - mean) / jnp.sqrt(var + EPS)
    return normed * weight[None, None, :] + bias[None, None, :]


if __name__ == "__main__":
    key = jax.random.PRNGKey(0)
    # Small but representative MVMoE shapes: embedding_dim=128 (lane-dense),
    # problem size P=20, batch of 8 instances.
    B, P, E = 8, 20, 128
    k1, k2, k3, k4 = jax.random.split(key, 4)
    input1 = jax.random.normal(k1, (B, P, E), dtype=jnp.float32)
    input2 = jax.random.normal(k2, (B, P, E), dtype=jnp.float32)
    # Non-trivial affine parameters (InstanceNorm1d affine=True) to exercise fusion.
    weight = 1.0 + 0.1 * jax.random.normal(k3, (E,), dtype=jnp.float32)
    bias = 0.1 * jax.random.normal(k4, (E,), dtype=jnp.float32)

    out = add_and_normalize(input1, input2, weight, bias)
    out = jax.block_until_ready(out)

    ref = _reference(input1, input2, weight, bias)
    assert out.shape == (B, P, E)
    assert jnp.allclose(out, ref, atol=1e-4, rtol=1e-4), (
        float(jnp.max(jnp.abs(out - ref))))

    # TODO(synk): other norm branches of the PyTorch module ('batch',
    # 'batch_no_track', 'layer', 'rezero', None) are config-dependent and not
    # exercised here; only the default 'instance' + norm_last path is implemented.
    print("KERNEL_OK")
</pallas_src>

<mosaic_0001>
module attributes {stable_mosaic.version = 11 : i64} {
  func.func @_add_instance_norm_kernel(%arg0: i32, %arg1: memref<4x20x128xf32, #tpu.memory_space<vmem>>, %arg2: memref<4x20x128xf32, #tpu.memory_space<vmem>>, %arg3: memref<1x128xf32, #tpu.memory_space<vmem>>, %arg4: memref<1x128xf32, #tpu.memory_space<vmem>>, %arg5: memref<4x20x128xf32, #tpu.memory_space<vmem>>) attributes {dimension_semantics = [#tpu.dimension_semantics<parallel>], iteration_bounds = array<i64: 2>, scalar_prefetch = 0 : i64, scratch_operands = 0 : i64, tpu.core_type = #tpu.core_type<tc>, window_params = [{transform_indices = @transform_0, window_bounds = array<i64: 4, 20, 128>}, {transform_indices = @transform_1, window_bounds = array<i64: 4, 20, 128>}, {pipeline_mode = #tpu.pipeline_mode<synchronous>, transform_indices = @transform_2, window_bounds = array<i64: 1, 128>}, {pipeline_mode = #tpu.pipeline_mode<synchronous>, transform_indices = @transform_3, window_bounds = array<i64: 1, 128>}, {transform_indices = @transform_4, window_bounds = array<i64: 4, 20, 128>}]} {
    %c0 = arith.constant 0 : index
    %c0_0 = arith.constant 0 : index
    %c0_1 = arith.constant 0 : index
    %0 = vector.load %arg1[%c0, %c0_0, %c0_1] : memref<4x20x128xf32, #tpu.memory_space<vmem>>, vector<4x20x128xf32>
    %c0_2 = arith.constant 0 : index
    %c0_3 = arith.constant 0 : index
    %c0_4 = arith.constant 0 : index
    %1 = vector.load %arg2[%c0_2, %c0_3, %c0_4] : memref<4x20x128xf32, #tpu.memory_space<vmem>>, vector<4x20x128xf32>
    %2 = arith.addf %0, %1 : vector<4x20x128xf32>
    %cst = arith.constant dense<0.000000e+00> : vector<4x128xf32>
    %3 = vector.multi_reduction <add>, %2, %cst [1] : vector<4x20x128xf32> to vector<4x128xf32>
    %4 = vector.shape_cast %3 : vector<4x128xf32> to vector<4x1x128xf32>
    %cst_5 = arith.constant 5.000000e-02 : f32
    %5 = vector.broadcast %cst_5 : f32 to vector<4x1x128xf32>
    %6 = arith.mulf %4, %5 : vector<4x1x128xf32>
    %7 = arith.mulf %2, %2 : vector<4x20x128xf32>
    %cst_6 = arith.constant dense<0.000000e+00> : vector<4x128xf32>
    %8 = vector.multi_reduction <add>, %7, %cst_6 [1] : vector<4x20x128xf32> to vector<4x128xf32>
    %9 = vector.shape_cast %8 : vector<4x128xf32> to vector<4x1x128xf32>
    %cst_7 = arith.constant 5.000000e-02 : f32
    %10 = vector.broadcast %cst_7 : f32 to vector<4x1x128xf32>
    %11 = arith.mulf %9, %10 : vector<4x1x128xf32>
    %12 = arith.mulf %6, %6 : vector<4x1x128xf32>
    %13 = arith.subf %11, %12 : vector<4x1x128xf32>
    %cst_8 = arith.constant 0.000000e+00 : f32
    %14 = vector.broadcast %cst_8 : f32 to vector<4x1x128xf32>
    %15 = arith.maximumf %13, %14 : vector<4x1x128xf32>
    %cst_9 = arith.constant 9.99999974E-6 : f32
    %16 = vector.broadcast %cst_9 : f32 to vector<4x1x128xf32>
    %17 = arith.addf %15, %16 : vector<4x1x128xf32>
    %18 = math.rsqrt %17 : vector<4x1x128xf32>
    %c0_10 = arith.constant 0 : index
    %c0_11 = arith.constant 0 : index
    %19 = vector.load %arg3[%c0_10, %c0_11] : memref<1x128xf32, #tpu.memory_space<vmem>>, vector<1x128xf32>
    %20 = vector.shape_cast %19 : vector<1x128xf32> to vector<1x1x128xf32>
    %21 = vector.broadcast %20 : vector<1x1x128xf32> to vector<4x1x128xf32>
    %22 = arith.mulf %18, %21 : vector<4x1x128xf32>
    %c0_12 = arith.constant 0 : index
    %c0_13 = arith.constant 0 : index
    %23 = vector.load %arg4[%c0_12, %c0_13] : memref<1x128xf32, #tpu.memory_space<vmem>>, vector<1x128xf32>
    %24 = arith.mulf %6, %22 : vector<4x1x128xf32>
    %25 = vector.shape_cast %23 : vector<1x128xf32> to vector<1x1x128xf32>
    %26 = vector.broadcast %25 : vector<1x1x128xf32> to vector<4x1x128xf32>
    %27 = arith.subf %26, %24 : vector<4x1x128xf32>
    %28 = vector.broadcast %22 : vector<4x1x128xf32> to vector<4x20x128xf32>
    %29 = arith.mulf %2, %28 : vector<4x20x128xf32>
    %30 = vector.broadcast %27 : vector<4x1x128xf32> to vector<4x20x128xf32>
    %31 = arith.addf %29, %30 : vector<4x20x128xf32>
    %c0_14 = arith.constant 0 : index
    %c0_15 = arith.constant 0 : index
    %c0_16 = arith.constant 0 : index
    %32 = vector.load %arg5[%c0_14, %c0_15, %c0_16] : memref<4x20x128xf32, #tpu.memory_space<vmem>>, vector<4x20x128xf32>
    tpu.vector_store %arg5[%c0_14, %c0_15, %c0_16], %31 {strides = array<i32>} : memref<4x20x128xf32, #tpu.memory_space<vmem>>, vector<4x20x128xf32>,
    return
  }
  func.func @transform_0(%arg0: i32) -> (i32, i32, i32) {
    %c0_i32 = arith.constant 0 : i32
    %c0_i32_0 = arith.constant 0 : i32
    %c0_i32_1 = arith.constant 0 : i32
    return %arg0, %c0_i32, %c0_i32_0 : i32, i32, i32
  }
  func.func @transform_1(%arg0: i32) -> (i32, i32, i32) {
    %c0_i32 = arith.constant 0 : i32
    %c0_i32_0 = arith.constant 0 : i32
    %c0_i32_1 = arith.constant 0 : i32
    return %arg0, %c0_i32, %c0_i32_0 : i32, i32, i32
  }
  func.func @transform_2(%arg0: i32) -> (i32, i32) {
    %c0_i32 = arith.constant 0 : i32
    %c0_i32_0 = arith.constant 0 : i32
    %c0_i32_1 = arith.constant 0 : i32
    return %c0_i32, %c0_i32_0 : i32, i32
  }
  func.func @transform_3(%arg0: i32) -> (i32, i32) {
    %c0_i32 = arith.constant 0 : i32
    %c0_i32_0 = arith.constant 0 : i32
    %c0_i32_1 = arith.constant 0 : i32
    return %c0_i32, %c0_i32_0 : i32, i32
  }
  func.func @transform_4(%arg0: i32) -> (i32, i32, i32) {
    %c0_i32 = arith.constant 0 : i32
    %c0_i32_0 = arith.constant 0 : i32
    %c0_i32_1 = arith.constant 0 : i32
    return %arg0, %c0_i32, %c0_i32_0 : i32, i32, i32
  }
}

</mosaic_0001>

<bundles_post_ra>
// kernel: tpu_custom_call.1
= control target key start
LH: loop header
LB: loop body
LE: loop exit
PB: predicated region body
PF: predicated region fallthrough
CT: control target
= control target key end

     0   :  { %s603_s15 = smov 0   ;;  %s766_s0 = inlined_call_operand.vmem [shape: f32[8,20,128], index: 0, kind: input, shape index: {}]   ;;  %s767_s1 = inlined_call_operand.vmem [shape: f32[8,20,128], index: 1, kind: input, shape index: {}]   ;;  %s768_s2 = inlined_call_operand.vmem [shape: f32[1,128], index: 2, kind: input, shape index: {}]   ;;  %s769_s3 = inlined_call_operand.vmem [shape: f32[1,128], index: 3, kind: input, shape index: {}]   ;;  %s770_s4 = inlined_call_operand.vmem [shape: f32[8,20,128], index: 4, kind: output, shape index: {}]  }
   0x1 LB: > { %s540_s16 = sadd.s32 4294967295, %s576_s15   ;;  %p544_p0 = scmp.ge.s32.totalorder %s576_s15, 1  ;;  %s576_s15 = sphi %s603_s15, %s14_s15  }
   0x2   : > { %p176_p1 = scmp.lt.s32.totalorder %s576_s15, 3 }
   0x4   : > { %p177_p2 = pnand %p544_p0, %p176_p1 }
   0x5   : > { %s545_s17 = sshll.u32 (!%p177_p2), %s540_s16, 2 }
   0x6   : > { %180 = sbr.rel (%p177_p2) target bundleno = 90 (0x5a), region = 36  ;;  %p211_p3 = scmp.lt.s32.totalorder (!%p177_p2), %s545_s17, 7 }
   0xb   : > { %s772_s17 = smov (!%p211_p3, %s545_s17), 7  ;;  %vm268_vm0 = vcmask 1043456  }
   0xc   : > { %s611_s18 = smul.u32 24, %s772_s17 }
   0xe   : > { %s617_s21 = scalar_lea.vmem %s766_s0, %s611_s18  ;;  %s623_s24 = scalar_lea.vmem %s767_s1, %s611_s18 }
   0xf   : > { %v231_v0 = vld [vmem:[%s617_s21] sm:$0xff]  ;;  %v232_v1 = vld [vmem:[%s617_s21 + $0x8] sm:$0xff]  ;;  %v233_v2 = vld [vmem:[%s617_s21 + $0x10] sm:$0xf]  ;;  %s738_s5 = scalar_lea.vmem %s770_s4, %s611_s18 }
  0x10   : > { %v243_v3 = vld [vmem:[%s623_s24] sm:$0xff]  ;;  %v244_v4 = vld [vmem:[%s623_s24 + $0x8] sm:$0xff]  ;;  %v245_v5 = vld [vmem:[%s623_s24 + $0x10] sm:$0xf] }
  0x11   : > { %v631_v6 = vadd.f32 %v243_v3, %v231_v0  ;;  %v633_v7 = vadd.f32 %v244_v4, %v232_v1  ;;  %v635_v8 = vadd.f32 %v245_v5, %v233_v2  ;;  %v234_v9 = vld [vmem:[%s617_s21 + $0x18] sm:$0xff]  ;;  %v235_v10 = vld [vmem:[%s617_s21 + $0x20] sm:$0xff]  ;;  %v236_v11 = vld [vmem:[%s617_s21 + $0x28] sm:$0xf] }
  0x12   : > { %v246_v12 = vld [vmem:[%s623_s24 + $0x18] sm:$0xff]  ;;  %v247_v13 = vld [vmem:[%s623_s24 + $0x20] sm:$0xff]  ;;  %v248_v14 = vld [vmem:[%s623_s24 + $0x28] sm:$0xf] }
  0x13   : > { %v267_v15 = vadd.f32 %v633_v7, %v631_v6  ;;  %v269_v16 = vsel %vm268_vm0, %v635_v8, 0.0  ;;  %v308_v17 = vmul.f32 %v631_v6, %v631_v6  ;;  %v309_v18 = vmul.f32 %v633_v7, %v633_v7  ;;  %v237_v19 = vld [vmem:[%s617_s21 + $0x30] sm:$0xff]  ;;  %v238_v20 = vld [vmem:[%s617_s21 + $0x38] sm:$0xff]  ;;  %v239_v29 = vld [vmem:[%s617_s21 + $0x40] sm:$0xf] }
  0x14   : > { %v310_v21 = vmul.f32 %v635_v8, %v635_v8  ;;  %v655_v22 = vadd.f32 %v246_v12, %v234_v9  ;;  %v657_v23 = vadd.f32 %v247_v13, %v235_v10  ;;  %v659_v24 = vadd.f32 %v248_v14, %v236_v11  ;;  %v249_v25 = vld [vmem:[%s623_s24 + $0x30] sm:$0xff]  ;;  %v250_v26 = vld [vmem:[%s623_s24 + $0x38] sm:$0xff]  ;;  %v251_v30 = vld [vmem:[%s623_s24 + $0x40] sm:$0xf] }
  0x15   : > { %v270_v27 = vadd.f32 %v269_v16, %v267_v15  ;;  %v320_v28 = vadd.f32 %v309_v18, %v308_v17  ;;  %v665_v31 = vadd.f32 %v249_v25, %v237_v19  ;;  %v667_v32 = vadd.f32 %v250_v26, %v238_v20  ;;  %v240_v49 = vld [vmem:[%s617_s21 + $0x48] sm:$0xff]  ;;  %v241_v55 = vld [vmem:[%s617_s21 + $0x50] sm:$0xff]  ;;  %v242_v60 = vld [vmem:[%s617_s21 + $0x58] sm:$0xf] }
  0x16   : > { %v321_v33 = vsel %vm268_vm0, %v310_v21, 0.0  ;;  %v277_v34 = vadd.f32 %v657_v23, %v655_v22  ;;  %v278_v35 = vsel %vm268_vm0, %v659_v24, 0.0  ;;  %v311_v36 = vmul.f32 %v655_v22, %v655_v22  ;;  %v252_v50 = vld [vmem:[%s623_s24 + $0x48] sm:$0xff]  ;;  %v253_v61 = vld [vmem:[%s623_s24 + $0x50] sm:$0xff]  ;;  %v254_v62 = vld [vmem:[%s623_s24 + $0x58] sm:$0xf] }
  0x17   : > { %v271_v37 = vrot.slane %v270_v27, 4  ;;  %v322_v38 = vadd.f32 %v321_v33, %v320_v28  ;;  %v312_v39 = vmul.f32 %v657_v23, %v657_v23  ;;  %v313_v40 = vmul.f32 %v659_v24, %v659_v24 }
  0x18   : > { %v279_v41 = vadd.f32 %v278_v35, %v277_v34  ;;  %v680_v42 = vadd.f32 %v251_v30, %v239_v29  ;;  %v286_v43 = vadd.f32 %v667_v32, %v665_v31  ;;  %v314_v44 = vmul.f32 %v665_v31, %v665_v31 }
  0x19   : > { %v272_v45 = vadd.f32 %v271_v37, %v270_v27  ;;  %v323_v46 = vrot.slane %v322_v38, 4  ;;  %v329_v47 = vadd.f32 %v312_v39, %v311_v36  ;;  %v330_v48 = vsel %vm268_vm0, %v313_v40, 0.0 }
  0x1a   : > { %v280_v51 = vrot.slane %v279_v41, 4  ;;  %v287_v52 = vsel %vm268_vm0, %v680_v42, 0.0  ;;  %v315_v53 = vmul.f32 %v667_v32, %v667_v32  ;;  %v316_v54 = vmul.f32 %v680_v42, %v680_v42 }
  0x1b   : > { %v273_v56 = vrot.slane %v272_v45, 2  ;;  %v324_v57 = vadd.f32 %v323_v46, %v322_v38  ;;  %v331_v58 = vadd.f32 %v330_v48, %v329_v47  ;;  %v288_v59 = vadd.f32 %v287_v52, %v286_v43 }
  0x1c   : > { %v281_v63 = vadd.f32 %v280_v51, %v279_v41  ;;  %v338_v0 = vadd.f32 %v315_v53, %v314_v44  ;;  %v339_v1 = vsel %vm268_vm0, %v316_v54, 0.0  ;;  %v700_v2 = vadd.f32 %v252_v50, %v240_v49 }
  0x1d   : > { %v274_v3 = vadd.f32 %v273_v56, %v272_v45  ;;  %v325_v4 = vrot.slane %v324_v57, 2  ;;  %v332_v5 = vrot.slane %v331_v58, 4  ;;  %v289_v9 = vrot.slane %v288_v59, 4 }
  0x1e   : > { %v282_v10 = vrot.slane %v281_v63, 2  ;;  %v340_v11 = vadd.f32 %v339_v1, %v338_v0  ;;  %v702_v12 = vadd.f32 %v253_v61, %v241_v55  ;;  %v704_v13 = vadd.f32 %v254_v62, %v242_v60 }
  0x1f   : > { %v275_v14 = vrot.slane %v274_v3, 1  ;;  %v326_v15 = vadd.f32 %v325_v4, %v324_v57  ;;  %v333_v16 = vadd.f32 %v332_v5, %v331_v58  ;;  %v290_v17 = vadd.f32 %v289_v9, %v288_v59 }
  0x20   : > { %v283_v18 = vadd.f32 %v282_v10, %v281_v63  ;;  %v341_v19 = vrot.slane %v340_v11, 4  ;;  %v295_v20 = vadd.f32 %v702_v12, %v700_v2  ;;  %v296_v21 = vsel %vm268_vm0, %v704_v13, 0.0 }
  0x21   : > { %v276_v25 = vadd.f32 %v275_v14, %v274_v3  ;;  %v327_v26 = vrot.slane %v326_v15, 1  ;;  %v334_v27 = vrot.slane %v333_v16, 2  ;;  %v291_v28 = vrot.slane %v290_v17, 2 }
  0x22   : > { %v284_v29 = vrot.slane %v283_v18, 1  ;;  %v342_v30 = vadd.f32 %v341_v19, %v340_v11  ;;  %v297_v33 = vadd.f32 %v296_v21, %v295_v20  ;;  %v317_v34 = vmul.f32 %v700_v2, %v700_v2 }
  0x23   : > { %v304_v35 = vmul.f32 0.05, %v276_v25  ;;  %v328_v36 = vadd.f32 %v327_v26, %v326_v15  ;;  %v335_v37 = vadd.f32 %v334_v27, %v333_v16  ;;  %v292_v38 = vadd.f32 %v291_v28, %v290_v17 }
  0x24   : > { %v285_v39 = vadd.f32 %v284_v29, %v283_v18  ;;  %v343_v40 = vrot.slane %v342_v30, 2  ;;  %v298_v41 = vrot.slane %v297_v33, 4  ;;  %v318_v43 = vmul.f32 %v702_v12, %v702_v12 }
  0x25   : > { %v356_v44 = vmul.f32 0.05, %v328_v36  ;;  %v360_v45 = vmul.f32 %v304_v35, %v304_v35  ;;  %v336_v46 = vrot.slane %v335_v37, 1  ;;  %v293_v47 = vrot.slane %v292_v38, 1  ;;  %v380_v36 = vld [vmem:[%s768_s2] sm:$0x1] }
  0x26   : > { %v714_v48 = vmul.f32 0.05, %v285_v39  ;;  %v344_v49 = vadd.f32 %v343_v40, %v342_v30  ;;  %v299_v50 = vadd.f32 %v298_v41, %v297_v33  ;;  %v319_v51 = vmul.f32 %v704_v13, %v704_v13 }
  0x27   : > { %v364_v52 = vsub.f32 %v356_v44, %v360_v45  ;;  %v337_v53 = vadd.f32 %v336_v46, %v335_v37  ;;  %v294_v54 = vadd.f32 %v293_v47, %v292_v38  ;;  %v347_v55 = vadd.f32 %v318_v43, %v317_v34  ;;  %v385_v43 = vld [vmem:[%s769_s3] sm:$0x1] }
  0x28   : > { %v361_v56 = vmul.f32 %v714_v48, %v714_v48  ;;  %v345_v57 = vrot.slane %v344_v49, 1  ;;  %v300_v58 = vrot.slane %v299_v50, 2  ;;  %v348_v59 = vsel %vm268_vm0, %v319_v51, 0.0 }
  0x29   : > { %v368_v60 = vmax.f32 %v364_v52, 0.0  ;;  %v357_v61 = vmul.f32 0.05, %v337_v53  ;;  %v306_v62 = vmul.f32 0.05, %v294_v54  ;;  %v349_v63 = vadd.f32 %v348_v59, %v347_v55 }
  0x2a   : > { %v346_v0 = vadd.f32 %v345_v57, %v344_v49  ;;  %v301_v1 = vadd.f32 %v300_v58, %v299_v50  ;;  %v394_v21 = vlaneseq }
  0x2b   : > { %v372_v3 = vadd.f32 1e-05, %v368_v60  ;;  %v365_v4 = vsub.f32 %v357_v61, %v361_v56  ;;  %v362_v5 = vmul.f32 %v306_v62, %v306_v62  ;;  %v350_v9 = vrot.slane %v349_v63, 4 }
  0x2c   : > { %v358_v10 = vmul.f32 0.05, %v346_v0  ;;  %v302_v11 = vrot.slane %v301_v1, 1  ;;  %v395_v29 = vshrl.u32 %v394_v21, 7 }
  0x2d   : > { %562 = vrsqrt.f32 %v372_v3  ;;  %v369_v14 = vmax.f32 %v365_v4, 0.0  ;;  %v351_v15 = vadd.f32 %v350_v9, %v349_v63 }
  0x2e   : > { %v366_v16 = vsub.f32 %v358_v10, %v362_v5  ;;  %v303_v17 = vadd.f32 %v302_v11, %v301_v1  ;;  %v396_v37 = vsub.s32 0, %v395_v29 }
  0x2f   : > { %v373_v18 = vadd.f32 1e-05, %v369_v14  ;;  %v352_v19 = vrot.slane %v351_v15, 2 }
  0x30   : > { %v370_v20 = vmax.f32 %v366_v16, 0.0  ;;  %v721_v25 = vmul.f32 0.05, %v303_v17 }
  0x31   : > { %564 = vrsqrt.f32 %v373_v18  ;;  %v353_v26 = vadd.f32 %v352_v19, %v351_v15 }
  0x32   : > { %v374_v27 = vadd.f32 1e-05, %v370_v20  ;;  %v363_v33 = vmul.f32 %v721_v25, %v721_v25 }
  0x33   : > { %v354_v28 = vrot.slane %v353_v26, 1 }
  0x34   : > { %566 = vrsqrt.f32 %v374_v27 }
  0x35   : > { %v355_v30 = vadd.f32 %v354_v28, %v353_v26 }
  0x37   : > { %v359_v34 = vmul.f32 0.05, %v355_v30 }
  0x39   : > { %v367_v38 = vsub.f32 %v359_v34, %v363_v33 }
  0x3a   : > { %v563_v39 = vpop.eup %562 }
  0x3b   : > { %v381_v40 = vmul.f32 %v563_v39, %v380_v36  ;;  %v371_v41 = vmax.f32 %v367_v38, 0.0 }
  0x3d   : > { %v386_v44 = vmul.f32 %v381_v40, %v304_v35  ;;  %v397_v45 = vrot.slane %v381_v40, %v396_v37  ;;  %v375_v46 = vadd.f32 1e-05, %v371_v41 }
  0x3e   : > { %v565_v47 = vpop.eup %564 }
  0x3f   : > { %v390_v49 = vsub.f32 %v385_v43, %v386_v44  ;;  %v410_v50 = vmul.f32 %v397_v45, %v631_v6  ;;  %v411_v51 = vmul.f32 %v397_v45, %v633_v7  ;;  %v412_v52 = vmul.f32 %v397_v45, %v635_v8 }
  0x40   : > { %v382_v53 = vmul.f32 %v565_v47, %v380_v36  ;;  %568 = vrsqrt.f32 %v375_v46 }
  0x41   : > { %v567_v54 = vpop.eup %566  ;;  %v429_v55 = vrot.slane %v390_v49, %v396_v37 }
  0x42   : > { %v387_v35 = vmul.f32 %v382_v53, %v714_v48  ;;  %v401_v56 = vrot.slane %v382_v53, %v396_v37  ;;  %v383_v6 = vmul.f32 %v567_v54, %v380_v36 }
  0x43   : > { %v446_v57 = vadd.f32 %v429_v55, %v410_v50  ;;  %v447_v7 = vadd.f32 %v429_v55, %v411_v51  ;;  %v448_v58 = vadd.f32 %v429_v55, %v412_v52 }
  0x44   : > { %v391_v8 = vsub.f32 %v385_v43, %v387_v35  ;;  %v413_v59 = vmul.f32 %v401_v56, %v655_v22  ;;  %v414_v60 = vmul.f32 %v401_v56, %v657_v23  ;;  %v415_v61 = vmul.f32 %v401_v56, %v659_v24 }
  0x45   : > { %458 = vst [vmem:[%s738_s5] sm:$0xff] %v446_v57  ;;  %459 = vst [vmem:[%s738_s5 + $0x8] sm:$0xff] %v447_v7  ;;  %v388_v63 = vmul.f32 %v383_v6, %v306_v62  ;;  %v405_v48 = vrot.slane %v383_v6, %v396_v37 }
  0x46   : > { %460 = vst [vmem:[%s738_s5 + $0x10] sm:$0xf] %v448_v58  ;;  %v433_v0 = vrot.slane %v391_v8, %v396_v37 }
  0x47   : > { %v392_v1 = vsub.f32 %v385_v43, %v388_v63  ;;  %v416_v3 = vmul.f32 %v405_v48, %v665_v31  ;;  %v417_v22 = vmul.f32 %v405_v48, %v667_v32  ;;  %v418_v23 = vmul.f32 %v405_v48, %v680_v42 }
  0x48   : > { %v449_v4 = vadd.f32 %v433_v0, %v413_v59  ;;  %v450_v24 = vadd.f32 %v433_v0, %v414_v60  ;;  %v451_v5 = vadd.f32 %v433_v0, %v415_v61 }
  0x49   : > { %v437_v9 = vrot.slane %v392_v1, %v396_v37 }
  0x4a   : > { %461 = vst [vmem:[%s738_s5 + $0x18] sm:$0xff] %v449_v4  ;;  %462 = vst [vmem:[%s738_s5 + $0x20] sm:$0xff] %v450_v24 }
  0x4b   : > { %463 = vst [vmem:[%s738_s5 + $0x28] sm:$0xf] %v451_v5  ;;  %v452_v62 = vadd.f32 %v437_v9, %v416_v3  ;;  %v453_v10 = vadd.f32 %v437_v9, %v417_v22  ;;  %v454_v11 = vadd.f32 %v437_v9, %v418_v23 }
  0x4d   : > { %v569_v14 = vpop.eup %568  ;;  %464 = vst [vmem:[%s738_s5 + $0x30] sm:$0xff] %v452_v62  ;;  %465 = vst [vmem:[%s738_s5 + $0x38] sm:$0xff] %v453_v10 }
  0x4e   : > { %466 = vst [vmem:[%s738_s5 + $0x40] sm:$0xf] %v454_v11  ;;  %v384_v31 = vmul.f32 %v569_v14, %v380_v36 }
  0x50   : > { %v389_v32 = vmul.f32 %v384_v31, %v721_v25  ;;  %v409_v42 = vrot.slane %v384_v31, %v396_v37 }
  0x52   : > { %v393_v15 = vsub.f32 %v385_v43, %v389_v32  ;;  %v419_v16 = vmul.f32 %v409_v42, %v700_v2  ;;  %v420_v17 = vmul.f32 %v409_v42, %v702_v12  ;;  %v421_v18 = vmul.f32 %v409_v42, %v704_v13 }
  0x54   : > { %v441_v19 = vrot.slane %v393_v15, %v396_v37 }
  0x56   : > { %v455_v20 = vadd.f32 %v441_v19, %v419_v16  ;;  %v456_v21 = vadd.f32 %v441_v19, %v420_v17  ;;  %v457_v26 = vadd.f32 %v441_v19, %v421_v18 }
  0x58   : > { %467 = vst [vmem:[%s738_s5 + $0x48] sm:$0xff] %v455_v20  ;;  %468 = vst [vmem:[%s738_s5 + $0x50] sm:$0xff] %v456_v21 }
  0x59   : > { %469 = vst [vmem:[%s738_s5 + $0x58] sm:$0xf] %v457_v26 }
  0x5a PF: > { %s14_s15 = sadd.s32 1, %s576_s15  }
  0x5b   : > { %p11_p4 = scmp.ge.s32.totalorder %s14_s15, 4  }
  0x5d   :  { %13 = sbr.rel (!%p11_p4) target bundleno = 1 (0x1), region = 69 }

</bundles_post_ra>
